<compile_context>
chip_gen: v7x
topology: tpu7x:2x2x1
jax: 0.10.0
libtpu: 0.0.40
codegen_flags: <defaults>
</compile_context>

<pallas_src>
import functools

import jax
import jax.numpy as jnp
from jax.experimental import pallas as pl
from jax.experimental.pallas import tpu as pltpu

IN_F = 40
HID = 256
OUT_F = 10
BN_EPS = 1e-5


# ----------------------------------------------------------------------------
# Kernels
# ----------------------------------------------------------------------------
def _fused_kernel(x_ref, w1_ref, gb_ref, w2b2_ref, o_ref, *, matmul_dtype):
    """Single-block path: whole batch resident in VMEM."""
    x = x_ref[...].astype(matmul_dtype)
    w1 = w1_ref[...].astype(matmul_dtype)
    # b1 is omitted: under training-mode BN it is exactly cancelled by the
    # mean subtraction.
    h = jnp.dot(x, w1, preferred_element_type=jnp.float32)          # (B, HID)

    mean = jnp.mean(h, axis=0, keepdims=True)                        # (1, HID)
    centered = h - mean
    var = jnp.mean(centered * centered, axis=0, keepdims=True)       # (1, HID)
    scale = jax.lax.rsqrt(var + BN_EPS) * gb_ref[0:1, :]             # gamma folded in
    h = jnp.maximum(centered * scale + gb_ref[1:2, :], 0.0)          # BN + ReLU

    w2 = w2b2_ref[:HID, :].astype(matmul_dtype)
    out = jnp.dot(h.astype(matmul_dtype), w2, preferred_element_type=jnp.float32)
    o_ref[...] = out + w2b2_ref[HID:HID + 1, :]


def _stats_kernel(x_ref, w1_ref, gb_ref, ss_ref, *, n_rows, matmul_dtype):
    """Pass 1: accumulate per-feature sum(h), sum(h^2); finalize to scale/shift."""
    i = pl.program_id(0)

    @pl.when(i == 0)
    def _():
        ss_ref[...] = jnp.zeros_like(ss_ref)

    x = x_ref[...].astype(matmul_dtype)
    w1 = w1_ref[...].astype(matmul_dtype)
    h = jnp.dot(x, w1, preferred_element_type=jnp.float32)           # (TB, HID)
    ss_ref[...] += jnp.concatenate(
        [jnp.sum(h, axis=0, keepdims=True),
         jnp.sum(h * h, axis=0, keepdims=True)], axis=0)             # (2, HID)

    @pl.when(i == pl.num_programs(0) - 1)
    def _():
        inv_n = jnp.float32(1.0 / n_rows)   # true batch count (zero-padded rows add 0)
        mean = ss_ref[0:1, :] * inv_n
        var = ss_ref[1:2, :] * inv_n - mean * mean
        scale = jax.lax.rsqrt(var + BN_EPS) * gb_ref[0:1, :]
        shift = gb_ref[1:2, :] - mean * scale
        ss_ref[...] = jnp.concatenate([scale, shift], axis=0)


def _apply_kernel(x_ref, w1_ref, ss_ref, w2b2_ref, o_ref, *, matmul_dtype):
    """Pass 2: recompute x@W1 per tile, fused BN (mul+add) + ReLU, second matmul."""
    x = x_ref[...].astype(matmul_dtype)
    w1 = w1_ref[...].astype(matmul_dtype)
    h = jnp.dot(x, w1, preferred_element_type=jnp.float32)           # (TB, HID)
    h = jnp.maximum(h * ss_ref[0:1, :] + ss_ref[1:2, :], 0.0)        # BN + ReLU

    w2 = w2b2_ref[:HID, :].astype(matmul_dtype)
    out = jnp.dot(h.astype(matmul_dtype), w2, preferred_element_type=jnp.float32)
    o_ref[...] = out + w2b2_ref[HID:HID + 1, :]


# ----------------------------------------------------------------------------
# Wrapper
# ----------------------------------------------------------------------------
def meta_stacking_head(x, w1, b1, gamma, beta, w2, b2, *,
                       block_rows=512, matmul_dtype=jnp.float32):
    """x: (B, 40) float32 -> (B, 10) float32."""
    del b1  # no-op under training-mode BatchNorm (cancelled by mean subtraction)
    B = x.shape[0]

    # Pack small params to cut the number of HBM->VMEM DMAs (7 refs -> 4 refs).
    gb = jnp.concatenate([gamma.reshape(1, HID), beta.reshape(1, HID)], axis=0)
    w2b2 = jnp.concatenate([w2, b2.reshape(1, OUT_F)], axis=0)        # (HID+1, OUT_F)

    if B <= block_rows:
        vmem = pl.BlockSpec(memory_space=pltpu.MemorySpace.VMEM)
        return pl.pallas_call(
            functools.partial(_fused_kernel, matmul_dtype=matmul_dtype),
            out_shape=jax.ShapeDtypeStruct((B, OUT_F), jnp.float32),
            in_specs=[vmem] * 4,
            out_specs=vmem,
        )(x, w1, gb, w2b2)

    # --- batch-tiled two-pass path -------------------------------------------
    nb = pl.cdiv(B, block_rows)
    b_pad = nb * block_rows
    x_in = jnp.pad(x, ((0, b_pad - B), (0, 0))) if b_pad != B else x

    # Pass 1: sufficient statistics -> (scale, shift), accumulator over grid.
    ss = pl.pallas_call(
        functools.partial(_stats_kernel, n_rows=B, matmul_dtype=matmul_dtype),
        out_shape=jax.ShapeDtypeStruct((2, HID), jnp.float32),
        grid_spec=pltpu.PrefetchScalarGridSpec(
            num_scalar_prefetch=0,
            grid=(nb,),
            in_specs=[pl.BlockSpec((block_rows, IN_F), lambda i: (i, 0)),
                      pl.BlockSpec((IN_F, HID), lambda i: (0, 0)),
                      pl.BlockSpec((2, HID), lambda i: (0, 0))],
            out_specs=pl.BlockSpec((2, HID), lambda i: (0, 0)),
        ),
        compiler_params=pltpu.CompilerParams(
            dimension_semantics=("arbitrary",)),   # accumulator across batch tiles
    )(x_in, w1, gb)

    # Pass 2: apply.  Batch axis is "parallel" -> megacore sharding on v7x.
    out = pl.pallas_call(
        functools.partial(_apply_kernel, matmul_dtype=matmul_dtype),
        out_shape=jax.ShapeDtypeStruct((b_pad, OUT_F), jnp.float32),
        grid_spec=pltpu.PrefetchScalarGridSpec(
            num_scalar_prefetch=0,
            grid=(nb,),
            in_specs=[pl.BlockSpec((block_rows, IN_F), lambda i: (i, 0)),
                      pl.BlockSpec((IN_F, HID), lambda i: (0, 0)),
                      pl.BlockSpec((2, HID), lambda i: (0, 0)),
                      pl.BlockSpec((HID + 1, OUT_F), lambda i: (0, 0))],
            out_specs=pl.BlockSpec((block_rows, OUT_F), lambda i: (i, 0)),
        ),
        compiler_params=pltpu.CompilerParams(
            dimension_semantics=("parallel",)),
    )(x_in, w1, ss, w2b2)

    return out[:B] if b_pad != B else out


# ----------------------------------------------------------------------------
# Params / reference
# ----------------------------------------------------------------------------
def init_params(key):
    """Deterministic init mimicking nn.Linear / nn.BatchNorm1d defaults."""
    k1, k2, k3, k4 = jax.random.split(key, 4)
    bound1 = 1.0 / jnp.sqrt(jnp.float32(IN_F))
    w1 = jax.random.uniform(k1, (IN_F, HID), jnp.float32, -bound1, bound1)
    b1 = jax.random.uniform(k2, (1, HID), jnp.float32, -bound1, bound1)
    gamma = jnp.ones((1, HID), jnp.float32)
    beta = jnp.zeros((1, HID), jnp.float32)
    bound2 = 1.0 / jnp.sqrt(jnp.float32(HID))
    w2 = jax.random.uniform(k3, (HID, OUT_F), jnp.float32, -bound2, bound2)
    b2 = jax.random.uniform(k4, (1, OUT_F), jnp.float32, -bound2, bound2)
    return w1, b1, gamma, beta, w2, b2


def reference(x, w1, b1, gamma, beta, w2, b2):
    """Pure-JAX reference of the same forward pass (train-mode BN)."""
    h = x @ w1 + b1
    mean = jnp.mean(h, axis=0, keepdims=True)
    var = jnp.mean((h - mean) ** 2, axis=0, keepdims=True)
    h = (h - mean) * jax.lax.rsqrt(var + BN_EPS) * gamma + beta
    h = jnp.maximum(h, 0.0)
    return h @ w2 + b2


if __name__ == "__main__":
    key = jax.random.PRNGKey(0)
    kx, kx2, kp = jax.random.split(key, 3)
    params = init_params(kp)

    # 1) Small batch -> single fused block, f32.
    B_small = 8
    x_small = jax.random.normal(kx, (B_small, IN_F), jnp.float32)
    out_small = jax.block_until_ready(meta_stacking_head(x_small, *params))
    ref_small = reference(x_small, *params)
    assert out_small.shape == (B_small, OUT_F), out_small.shape
    assert jnp.allclose(out_small, ref_small, atol=1e-3, rtol=1e-3), "fused mismatch"

    # 2) Larger batch -> two-pass tiled path, f32 (also exercises batch padding).
    B_big = 1000
    x_big = jax.random.normal(kx2, (B_big, IN_F), jnp.float32)
    out_big = jax.block_until_ready(
        meta_stacking_head(x_big, *params, block_rows=256))
    ref_big = reference(x_big, *params)
    assert out_big.shape == (B_big, OUT_F), out_big.shape
    assert jnp.allclose(out_big, ref_big, atol=1e-3, rtol=1e-3), "tiled mismatch"

    # 3) bf16 MXU operands (v6e/v5e tuning knob); BN math stays f32.
    out_bf16 = jax.block_until_ready(
        meta_stacking_head(x_small, *params, matmul_dtype=jnp.bfloat16))
    assert jnp.allclose(out_bf16, ref_small, atol=1e-1, rtol=1e-1), "bf16 mismatch"

    print("KERNEL_OK")
</pallas_src>

<mosaic_0001>
module attributes {stable_mosaic.version = 11 : i64} {
  func.func @_fused_kernel(%arg0: memref<8x40xf32, #tpu.memory_space<vmem>>, %arg1: memref<40x256xf32, #tpu.memory_space<vmem>>, %arg2: memref<2x256xf32, #tpu.memory_space<vmem>>, %arg3: memref<257x10xf32, #tpu.memory_space<vmem>>, %arg4: memref<8x10xf32, #tpu.memory_space<vmem>>) attributes {dimension_semantics = [], scalar_prefetch = 0 : i64, scratch_operands = 0 : i64, tpu.core_type = #tpu.core_type<tc>} {
    %c0 = arith.constant 0 : index
    %c0_0 = arith.constant 0 : index
    %0 = vector.load %arg0[%c0, %c0_0] : memref<8x40xf32, #tpu.memory_space<vmem>>, vector<8x40xf32>
    %c0_1 = arith.constant 0 : index
    %c0_2 = arith.constant 0 : index
    %1 = vector.load %arg1[%c0_1, %c0_2] : memref<40x256xf32, #tpu.memory_space<vmem>>, vector<40x256xf32>
    %cst = arith.constant dense<0.000000e+00> : vector<8x256xf32>
    %2 = tpu.matmul %0, %1, %cst {dimension_numbers = #tpu.dot_dimension_numbers<[1], [0], [0], [1], [0, 0, 1, 1], [], []>} : vector<8x40xf32>, vector<40x256xf32>, vector<8x256xf32> -> vector<8x256xf32>
    %cst_3 = arith.constant dense<0.000000e+00> : vector<256xf32>
    %3 = vector.multi_reduction <add>, %2, %cst_3 [0] : vector<8x256xf32> to vector<256xf32>
    %4 = vector.shape_cast %3 : vector<256xf32> to vector<1x256xf32>
    %cst_4 = arith.constant 8.000000e+00 : f32
    %5 = vector.broadcast %cst_4 : f32 to vector<1x256xf32>
    %6 = arith.divf %4, %5 : vector<1x256xf32>
    %7 = vector.broadcast %6 : vector<1x256xf32> to vector<8x256xf32>
    %8 = arith.subf %2, %7 : vector<8x256xf32>
    %9 = arith.mulf %8, %8 : vector<8x256xf32>
    %cst_5 = arith.constant dense<0.000000e+00> : vector<256xf32>
    %10 = vector.multi_reduction <add>, %9, %cst_5 [0] : vector<8x256xf32> to vector<256xf32>
    %11 = vector.shape_cast %10 : vector<256xf32> to vector<1x256xf32>
    %cst_6 = arith.constant 8.000000e+00 : f32
    %12 = vector.broadcast %cst_6 : f32 to vector<1x256xf32>
    %13 = arith.divf %11, %12 : vector<1x256xf32>
    %cst_7 = arith.constant 9.99999974E-6 : f32
    %14 = vector.broadcast %cst_7 : f32 to vector<1x256xf32>
    %15 = arith.addf %13, %14 : vector<1x256xf32>
    %16 = math.rsqrt %15 : vector<1x256xf32>
    %c0_8 = arith.constant 0 : index
    %c0_9 = arith.constant 0 : index
    %17 = vector.load %arg2[%c0_8, %c0_9] : memref<2x256xf32, #tpu.memory_space<vmem>>, vector<1x256xf32>
    %18 = arith.mulf %16, %17 : vector<1x256xf32>
    %19 = vector.broadcast %18 : vector<1x256xf32> to vector<8x256xf32>
    %20 = arith.mulf %8, %19 : vector<8x256xf32>
    %c1 = arith.constant 1 : index
    %c0_10 = arith.constant 0 : index
    %21 = vector.load %arg2[%c1, %c0_10] : memref<2x256xf32, #tpu.memory_space<vmem>>, vector<1x256xf32>
    %22 = vector.broadcast %21 : vector<1x256xf32> to vector<8x256xf32>
    %23 = arith.addf %20, %22 : vector<8x256xf32>
    %cst_11 = arith.constant 0.000000e+00 : f32
    %24 = vector.broadcast %cst_11 : f32 to vector<8x256xf32>
    %25 = arith.maximumf %23, %24 : vector<8x256xf32>
    %c0_12 = arith.constant 0 : index
    %c0_13 = arith.constant 0 : index
    %26 = vector.load %arg3[%c0_12, %c0_13] : memref<257x10xf32, #tpu.memory_space<vmem>>, vector<256x10xf32>
    %cst_14 = arith.constant dense<0.000000e+00> : vector<8x10xf32>
    %27 = tpu.matmul %25, %26, %cst_14 {dimension_numbers = #tpu.dot_dimension_numbers<[1], [0], [0], [1], [0, 0, 1, 1], [], []>} : vector<8x256xf32>, vector<256x10xf32>, vector<8x10xf32> -> vector<8x10xf32>
    %c256 = arith.constant 256 : index
    %c0_15 = arith.constant 0 : index
    %28 = vector.load %arg3[%c256, %c0_15] : memref<257x10xf32, #tpu.memory_space<vmem>>, vector<1x10xf32>
    %29 = vector.broadcast %28 : vector<1x10xf32> to vector<8x10xf32>
    %30 = arith.addf %27, %29 : vector<8x10xf32>
    %c0_16 = arith.constant 0 : index
    %c0_17 = arith.constant 0 : index
    %31 = vector.load %arg4[%c0_16, %c0_17] : memref<8x10xf32, #tpu.memory_space<vmem>>, vector<8x10xf32>
    tpu.vector_store %arg4[%c0_16, %c0_17], %30 {strides = array<i32>} : memref<8x10xf32, #tpu.memory_space<vmem>>, vector<8x10xf32>,
    return
  }
}

</mosaic_0001>

<bundles_post_ra>
// kernel: tpu_custom_call.1
= control target key start
LH: loop header
LB: loop body
LE: loop exit
PB: predicated region body
PF: predicated region fallthrough
CT: control target
= control target key end

     0   :  { %v413_v7 = vmov 0.0   ;;  %s590_s0 = inlined_call_operand.vmem [shape: f32[8,40], index: 0, kind: input, shape index: {}]   ;;  %s591_s1 = inlined_call_operand.vmem [shape: f32[40,256], index: 1, kind: input, shape index: {}]   ;;  %s592_s2 = inlined_call_operand.vmem [shape: f32[2,256], index: 2, kind: input, shape index: {}]   ;;  %s593_s3 = inlined_call_operand.vmem [shape: f32[257,10], index: 3, kind: input, shape index: {}]   ;;  %s594_s4 = inlined_call_operand.hbm [shape: f32[8,10], index: 4, kind: output, shape index: {}]  }
   0x1   :  { %v20_v0 = vld [vmem:[%s591_s1 + $0x8] sm:$0xff]  ;;  %v22_v1 = vld [vmem:[%s591_s1 + $0x18] sm:$0xff]  ;;  %v19_v2 = vld [vmem:[%s591_s1] sm:$0xff]  ;;  %97 = vmatprep.mubr.f32.mxu0 %v413_v7 }
   0x2   :  { %v343_v3 = vpack.c.bf16 %v22_v1, %v20_v0  ;;  %v21_v4 = vld [vmem:[%s591_s1 + $0x10] sm:$0xff]  ;;  %v24_v5 = vld [vmem:[%s591_s1 + $0x28] sm:$0xff]  ;;  %v26_v6 = vld [vmem:[%s591_s1 + $0x38] sm:$0xff] }
   0x3   :  { %v345_v8 = vpack.c.bf16 %v21_v4, %v19_v2  ;;  %v347_v9 = vpack.c.bf16 %v26_v6, %v24_v5  ;;  %v23_v10 = vld [vmem:[%s591_s1 + $0x20] sm:$0xff]  ;;  %v25_v11 = vld [vmem:[%s591_s1 + $0x30] sm:$0xff] }
   0x4   :  { %344 = vmatprep.subr.bf16.mxu0 %v343_v3 }
   0x5   :  { %9 = vsyncpa [#allocation3], 0  ;;  %346 = vmatpush1.bf16.msra.mxu0 %v345_v8  ;;  %v349_v12 = vpack.c.bf16 %v25_v11, %v23_v10  ;;  %v28_v13 = vld [vmem:[%s591_s1 + $0x48] sm:$0xff]  ;;  %v27_v14 = vld [vmem:[%s591_s1 + $0x40] sm:$0xff]  ;;  %vm29_vm0 = vcmask 326656   ;;  %vm289_vm1 = vcmask 80896  }
   0x6   :  { %348 = vmatprep.subr.bf16.mxu0 %v347_v9  ;;  %v18_v15 = vld [vmem:[%s590_s0] sm:$0xff]  ;;  %v199_v17 = vld [vmem:[%s593_s3 + $0x88] sm:$0xff]  ;;  %v200_v22 = vld [vmem:[%s593_s3 + $0x90] sm:$0xff] }
   0x7   :  { %v198_v16 = vld [vmem:[%s593_s3 + $0x80] sm:$0xff]  ;;  %v183_v20 = vld [vmem:[%s593_s3 + $0x8] sm:$0xff]  ;;  %v201_v23 = vld [vmem:[%s593_s3 + $0x98] sm:$0xff] }
   0x8   :  { %v351_v18 = vpack.c.bf16 %v199_v17, %v198_v16  ;;  %v182_v19 = vld [vmem:[%s593_s3] sm:$0xff]  ;;  %v355_v24 = vpack.c.bf16 %v201_v23, %v200_v22  ;;  %v184_v25 = vld [vmem:[%s593_s3 + $0x10] sm:$0xff]  ;;  %v185_v26 = vld [vmem:[%s593_s3 + $0x18] sm:$0xff] }
   0x9   :  { %350 = vmatpush1.bf16.msra.mxu0 %v349_v12  ;;  %v353_v21 = vpack.c.bf16 %v183_v20, %v182_v19  ;;  %v357_v27 = vpack.c.bf16 %v185_v26, %v184_v25  ;;  %v202_v28 = vld [vmem:[%s593_s3 + $0xa0] sm:$0xff]  ;;  %v203_v29 = vld [vmem:[%s593_s3 + $0xa8] sm:$0xff]  ;;  %v204_v34 = vld [vmem:[%s593_s3 + $0xb0] sm:$0xff] }
   0xa   :  { %41 = vmatprep.subr.mxu0 %v28_v13  ;;  %352 = vmatprep.subr.bf16.mxu1 %v351_v18  ;;  %v359_v30 = vpack.c.bf16 %v203_v29, %v202_v28  ;;  %v186_v31 = vld [vmem:[%s593_s3 + $0x20] sm:$0xff]  ;;  %v187_v32 = vld [vmem:[%s593_s3 + $0x28] sm:$0xff]  ;;  %v205_v35 = vld [vmem:[%s593_s3 + $0xb8] sm:$0xff] }
   0xb   :  { %354 = vmatpush3.bf16.msra.mxu1 %v353_v21  ;;  %v361_v33 = vpack.c.bf16 %v187_v32, %v186_v31  ;;  %v363_v36 = vpack.c.bf16 %v205_v35, %v204_v34  ;;  %v188_v37 = vld [vmem:[%s593_s3 + $0x30] sm:$0xff]  ;;  %v189_v38 = vld [vmem:[%s593_s3 + $0x38] sm:$0xff]  ;;  %v206_v40 = vld [vmem:[%s593_s3 + $0xc0] sm:$0xff]  ;;  %v143_v31 = vlaneseq }
   0xc   :  { %356 = vmatprep.subr.bf16.mxu1 %v355_v24  ;;  %v365_v39 = vpack.c.bf16 %v189_v38, %v188_v37  ;;  %v207_v41 = vld [vmem:[%s593_s3 + $0xc8] sm:$0xff]  ;;  %v190_v43 = vld [vmem:[%s593_s3 + $0x40] sm:$0xff]  ;;  %v208_v46 = vld [vmem:[%s593_s3 + $0xd0] sm:$0xff] }
   0xd   :  { %42 = vmatpush1.msra.mxu0 %v27_v14  ;;  %v367_v42 = vpack.c.bf16 %v207_v41, %v206_v40  ;;  %v191_v44 = vld [vmem:[%s593_s3 + $0x48] sm:$0xff]  ;;  %v209_v47 = vld [vmem:[%s593_s3 + $0xd8] sm:$0xff]  ;;  %v192_v49 = vld [vmem:[%s593_s3 + $0x50] sm:$0xff] }
   0xe   :  { %305 = vmatmul.mubr.msk.f32.vlgmr.msra.gmra.mrb[0].mxu0 %vm29_vm0, %v18_v15  ;;  %v369_v45 = vpack.c.bf16 %v191_v44, %v190_v43  ;;  %v371_v48 = vpack.c.bf16 %v209_v47, %v208_v46  ;;  %v193_v50 = vld [vmem:[%s593_s3 + $0x58] sm:$0xff]  ;;  %v210_v52 = vld [vmem:[%s593_s3 + $0xe0] sm:$0xff]  ;;  %v211_v53 = vld [vmem:[%s593_s3 + $0xe8] sm:$0xff] }
   0xf   :  { %358 = vmatpush3.bf16.msra.mxu1 %v357_v27  ;;  %v373_v51 = vpack.c.bf16 %v193_v50, %v192_v49  ;;  %v375_v54 = vpack.c.bf16 %v211_v53, %v210_v52  ;;  %v194_v55 = vld [vmem:[%s593_s3 + $0x60] sm:$0xff]  ;;  %v195_v56 = vld [vmem:[%s593_s3 + $0x68] sm:$0xff]  ;;  %v212_v58 = vld [vmem:[%s593_s3 + $0xf0] sm:$0xff] }
  0x10   :  { %360 = vmatprep.subr.bf16.mxu1 %v359_v30  ;;  %v377_v57 = vpack.c.bf16 %v195_v56, %v194_v55  ;;  %v213_v59 = vld [vmem:[%s593_s3 + $0xf8] sm:$0xff]  ;;  %v196_v60 = vld [vmem:[%s593_s3 + $0x70] sm:$0xff]  ;;  %v306_v44 = vld [vmem:[%s592_s2 + $0x1] ss:$2 sm:$0x3] }
  0x11   :  { %v379_v61 = vpack.c.bf16 %v213_v59, %v212_v58  ;;  %v197_v62 = vld [vmem:[%s593_s3 + $0x78] sm:$0xff]  ;;  %v307_v59 = vld [vmem:[%s593_s3 + $0x100] ss:$0 sm:$0xff] }
  0x12   :  { %v381_v63 = vpack.c.bf16 %v197_v62, %v196_v60 }
  0x13   :  { %362 = vmatpush3.bf16.msra.mxu1 %v361_v33 }
  0x14   :  { %364 = vmatprep.subr.bf16.mxu1 %v363_v36  ;;  %v144_v36 = vshrl.u32 %v143_v31, 7 }
  0x16   :  { %v145_v38 = vsub.s32 0, %v144_v36  ;;  %v149_v40 = vsub.s32 1, %v144_v36 }
  0x17   :  { %366 = vmatpush3.bf16.msra.mxu1 %v365_v39  ;;  %v141_v39 = vld [vmem:[%s592_s2] ss:$2 sm:$0x3]  ;;  %s414_s2 = smov [#allocation2]  }
  0x18   :  { %368 = vmatprep.subr.bf16.mxu1 %v367_v42  ;;  %v146_v41 = vrot.slane %v141_v39, %v145_v38  ;;  %v150_v42 = vrot.slane %v141_v39, %v149_v40  ;;  %v171_v49 = vrot.slane %v306_v44, %v145_v38  ;;  %s297_s23 = sshll.u32 %s414_s2, 4  ;;  %s298_s23 = int_to_ptr.vmem [resolvable:$true] %s297_s23 }
  0x19   :  { %s389_s24 = scalar_lea.vmem %s298_s23, 128  ;;  %p394_p1 = scmp.lt.s32.totalorder %s298_s23, %s298_s23 }
  0x1a   :  { %p390_p0 = scmp.ne.s32.totalorder %s298_s23, %s389_s24  ;;  %p395_p2 = scmp.lt.s32.totalorder %s389_s24, %s389_s24 }
  0x1b   :  { %370 = vmatpush3.bf16.msra.mxu1 %v369_v45 }
  0x1c   :  { %372 = vmatprep.subr.bf16.mxu1 %v371_v48  ;;  %p396_p3 = por %p395_p2, %p394_p1 }
  0x1e   :  { %p397_p4 = pnand %p396_p3, %p390_p0 }
  0x1f   :  { %374 = vmatpush3.bf16.msra.mxu1 %v373_v51  ;;  %v175_v51 = vrot.slane %v306_v44, %v149_v40 }
  0x20   :  { %376 = vmatprep.subr.bf16.mxu1 %v375_v54 }
  0x23   :  { %378 = vmatpush3.bf16.msra.mxu1 %v377_v57 }
  0x24   :  { %380 = vmatprep.subr.bf16.mxu1 %v379_v61 }
  0x27   :  { %382 = vmatpush3.bf16.msra.mxu1 %v381_v63 }
  0xe1   :  { %v99_v0 = vpop.f32.mrb[0].mxu0 }
  0xe2   :  { %v104_v1 = vrot.slane %v99_v0, 4  ;;  %v101_v2 = vpop.f32.mrb[1].mxu0 }
  0xe3   :  { %v110_v3 = vrot.slane %v101_v2, 4 }
  0xe4   :  { %v105_v4 = vadd.f32 %v104_v1, %v99_v0 }
  0xe5   :  { %v111_v5 = vadd.f32 %v110_v3, %v101_v2 }
  0xe6   :  { %v106_v6 = vrot.slane %v105_v4, 2 }
  0xe7   :  { %v112_v7 = vrot.slane %v111_v5, 2 }
  0xe8   :  { %v107_v8 = vadd.f32 %v106_v6, %v105_v4 }
  0xe9   :  { %v113_v9 = vadd.f32 %v112_v7, %v111_v5 }
  0xea   :  { %v108_v10 = vrot.slane %v107_v8, 1 }
  0xeb   :  { %v114_v11 = vrot.slane %v113_v9, 1 }
  0xec   :  { %v109_v12 = vadd.f32 %v108_v10, %v107_v8 }
  0xed   :  { %v115_v13 = vadd.f32 %v114_v11, %v113_v9 }
  0xee   :  { %v117_v14 = vmul.f32 0.125, %v109_v12 }
  0xef   :  { %v118_v15 = vmul.f32 0.125, %v115_v13 }
  0xf0   :  { %v119_v16 = vsub.f32 %v99_v0, %v117_v14 }
  0xf1   :  { %v120_v17 = vsub.f32 %v101_v2, %v118_v15 }
  0xf2   :  { %v121_v18 = vmul.f32 %v119_v16, %v119_v16 }
  0xf3   :  { %v122_v19 = vmul.f32 %v120_v17, %v120_v17 }
  0xf4   :  { %v123_v20 = vrot.slane %v121_v18, 4 }
  0xf5   :  { %v129_v21 = vrot.slane %v122_v19, 4 }
  0xf6   :  { %v124_v22 = vadd.f32 %v123_v20, %v121_v18 }
  0xf7   :  { %v130_v23 = vadd.f32 %v129_v21, %v122_v19 }
  0xf8   :  { %v125_v24 = vrot.slane %v124_v22, 2 }
  0xf9   :  { %v131_v25 = vrot.slane %v130_v23, 2 }
  0xfa   :  { %v126_v26 = vadd.f32 %v125_v24, %v124_v22 }
  0xfb   :  { %v132_v27 = vadd.f32 %v131_v25, %v130_v23 }
  0xfc   :  { %v127_v28 = vrot.slane %v126_v26, 1 }
  0xfd   :  { %v133_v29 = vrot.slane %v132_v27, 1 }
  0xfe   :  { %v128_v30 = vadd.f32 %v127_v28, %v126_v26 }
  0xff   :  { %v134_v32 = vadd.f32 %v133_v29, %v132_v27 }
 0x100   :  { %v135_v33 = vmul.f32 0.125, %v128_v30 }
 0x101   :  { %v136_v34 = vmul.f32 0.125, %v134_v32 }
 0x102   :  { %v137_v35 = vadd.f32 1e-05, %v135_v33 }
 0x103   :  { %v138_v37 = vadd.f32 1e-05, %v136_v34 }
 0x104   :  { %385 = vrsqrt.f32 %v137_v35 }
 0x105   :  { %387 = vrsqrt.f32 %v138_v37 }
 0x10e   :  { %v386_v43 = vpop.eup %385 }
 0x10f   :  { %v388_v45 = vpop.eup %387  ;;  %v153_v46 = vmul.f32 %v386_v43, %v146_v41 }
 0x110   :  { %v154_v47 = vmul.f32 %v388_v45, %v150_v42 }
 0x111   :  { %v158_v48 = vrot.slane %v153_v46, %v145_v38 }
 0x112   :  { %v162_v50 = vrot.slane %v154_v47, %v145_v38 }
 0x113   :  { %v163_v52 = vmul.f32 %v158_v48, %v119_v16 }
 0x114   :  { %v164_v53 = vmul.f32 %v162_v50, %v120_v17 }
 0x115   :  { %v178_v54 = vadd.f32 %v171_v49, %v163_v52 }
 0x116   :  { %v179_v55 = vadd.f32 %v175_v51, %v164_v53 }
 0x117   :  { %v180_v57 = vmax.f32 %v178_v54, 0.0 }
 0x118   :  { %v181_v56 = vmax.f32 %v179_v55, 0.0 }
 0x11a   :  { %283 = vmatprep.mubr.f32.mxu1 %v181_v56 }
 0x11b   :  { %284 = vmatmul.mubr.f32.vlgmr.msra.gmra.mrb[0].mxu1 %v180_v57 }
 0x1ee   :  { %v340_v58 = vpop.f32.mrb[0].mxu1 }
 0x1ef   :  { %v341_v60 = vpop.f32.mrb[1].mxu1 }
 0x1f0   :  { %v342_v61 = vadd.f32 %v341_v60, %v340_v58 }
 0x1f2   :  { %v286_v62 = vadd.f32 %v342_v61, %v307_v59 }
 0x1f4   :  { %290 = vst.msk [vmem:[#allocation2] sm:$0xff] %vm289_vm1, %v286_v62 }
 0x1f5   :  { %400 = shalt.err (!%p397_p4)
}
 0x1f6   :  { %s401_s27 = scalar_lea.hbm %s594_s4, 128 }
 0x1f7   :  { %p402_p5 = scmp.ne.s32.totalorder %s594_s4, %s401_s27  ;;  %p405_p6 = scmp.lt.u32.totalorder %s401_s27, %s594_s4 }
 0x1f9   :  { %p407_p7 = pnand %p405_p6, %p402_p5 }
 0x1fb   :  { %410 = shalt.err (!%p407_p7)
}
 0x1fc   :  { %300 = dma.vmem_to_hbm [thread:$0]  %s298_s23, 128, %s594_s4, [#allocation3]  }
 0x1fd   :  { %411 = dma.done.wait [#allocation3], 128  }
 0x1fe   :  { %412 = vsyncadd [#allocation3], 4294967168 }
 0x1ff   :  { %304 = vsyncpa [#allocation3], 1 }

</bundles_post_ra>
